<compile_context>
chip_gen: v7x
topology: tpu7x:2x2x1
jax: 0.10.0
libtpu: 0.0.40
codegen_flags: <defaults>
</compile_context>

<pallas_src>
import functools

import jax
import jax.numpy as jnp
from jax.experimental import pallas as pl
from jax.experimental.pallas import tpu as pltpu


class DefaultConfig:
    fpn_out_channels = 32
    class_num = 4           # synthetic small class count
    theta_class_num = 3     # channels of theta-classification branch (inputs[3])
    strides = (8, 16, 32, 64, 128)
    score_threshold = 0.3
    nms_iou_threshold = 0.5
    max_detection_boxes_num = 50
    T_a = 10.0


def _round_up(x, m):
    return ((x + m - 1) // m) * m


_LANE_CHUNK = 512     # in-kernel decode strip width (bounds live vregs)
_MAX_TILE_M = 2048    # DMA tile width along the position (lane) axis


def _choose_tile_m(n):
    """Lane-aligned tile; small inputs are not over-padded, big inputs get 2048."""
    return min(_MAX_TILE_M, _round_up(max(n, 1), _LANE_CHUNK))


# -----------------------------------------------------------------------------
# Fused Pallas kernel: 1x1-conv head projection (MXU) + DetectHead decode.
#
# Head-output row layout (channels on sublanes, positions on lanes):
#   rows [0, class_num)                    : cls logits
#   row  class_num                         : cnt logit (unused by DetectHead)
#   rows [class_num+1, class_num+6)        : reg (l, t, r, b, angle)
#   rows [class_num+6, +theta_class_num)   : theta-class logits
#   row  class_num+6+theta_class_num       : tr logit
#
# Merged output rows: 0..3 = x1,y1,x2,y2 ; 4 = theta ; 5 = score ; 6 = class ; 7 = 0
# -----------------------------------------------------------------------------
def _fused_head_decode_kernel(wT_ref, b_ref, xT_ref, aux_ref, out_ref,
                              *, class_num, theta_class_num, chunk):
    cout_pad = wT_ref.shape[0]
    tile_m = xT_ref.shape[1]
    n_chunks = tile_m // chunk

    w = wT_ref[...]                                              # resident, tiny
    bias = jnp.broadcast_to(b_ref[...], (cout_pad, chunk))       # hoisted broadcast

    r0 = class_num + 1                   # first reg row (skip cnt row)
    tc0 = r0 + 5                         # first theta-class row
    tr_row = tc0 + theta_class_num       # theta-regression row

    @pl.loop(0, n_chunks)
    def _(c):
        off = pl.multiple_of(c * chunk, chunk)
        lanes = pl.ds(off, chunk)

        x = xT_ref[:, lanes]                                     # [Cin, chunk] bf16
        # MXU: [Cout_pad, Cin] (bf16) @ [Cin, chunk] (bf16) -> [Cout_pad, chunk] f32
        h = jnp.dot(w, x, preferred_element_type=jnp.float32) + bias

        def first_argmax_rows(row0, nrows):
            """torch.max-style (first index wins on ties); index kept in f32."""
            best = h[row0:row0 + 1, :]
            best_idx = jnp.zeros_like(best)
            for r in range(1, nrows):
                row = h[row0 + r:row0 + r + 1, :]
                take = row > best                  # strict '>' keeps earlier index
                best = jnp.where(take, row, best)
                best_idx = jnp.where(take, jnp.float32(r), best_idx)
            return best, best_idx

        cxy = aux_ref[0:2, lanes]                                # [2, chunk] (cx, cy)
        stride = aux_ref[2:3, lanes]                             # [1, chunk]
        valid = aux_ref[3:4, lanes] > 0.5                        # [1, chunk]

        # --- cls branch: sigmoid is monotonic -> argmax/max on raw logits. ---
        cls_best, cls_idx = first_argmax_rows(0, class_num)
        score = jnp.where(valid, jax.nn.sigmoid(cls_best), -1e30)
        cls_f = cls_idx + 1.0                                    # classes are 1-based

        # --- theta branch: theta = (argmax(tc)+1) * 10 + raw tr logit. ---
        _, t_idx = first_argmax_rows(tc0, theta_class_num)
        theta = (t_idx + 1.0) * 10.0 + h[tr_row:tr_row + 1, :]

        # --- reg branch: ltrb * per-location stride, then _coords2boxes. ---
        # (raw-angle row r0+4 feeds pred_theta which PyTorch never uses; skipped.)
        lt = h[r0:r0 + 2, :] * stride
        rb = h[r0 + 2:r0 + 4, :] * stride
        x1y1 = jnp.where(valid, cxy - lt, 0.0)
        x2y2 = jnp.where(valid, cxy + rb, 0.0)
        theta = jnp.where(valid, theta, 0.0)

        # Single merged output stream (one DMA per grid step), lane-dense stores.
        out_ref[0:2, lanes] = x1y1
        out_ref[2:4, lanes] = x2y2
        out_ref[4:5, lanes] = theta
        out_ref[5:6, lanes] = score
        out_ref[6:7, lanes] = cls_f
        out_ref[7:8, lanes] = jnp.zeros_like(score)


def fused_head_decode(wT, b_col, xTb, aux, *, class_num, theta_class_num, tile_m):
    """wT: [Cout_pad, Cin] bf16, b_col: [Cout_pad, 1] f32,
    xTb: [B, Cin, N_pad] bf16 (channels on sublanes, positions on lanes),
    aux: [4, N_pad] f32 (rows cx, cy, stride, valid; batch-invariant).
    Returns packed [B, 8, N_pad] f32 (x1,y1,x2,y2,theta,score,class,0)."""
    cout_pad, cin = wT.shape
    B, _, n_pad = xTb.shape
    grid = (n_pad // tile_m, B)     # batch innermost -> aux block stays resident
    kernel = functools.partial(
        _fused_head_decode_kernel, class_num=class_num,
        theta_class_num=theta_class_num, chunk=min(_LANE_CHUNK, tile_m))
    return pl.pallas_call(
        kernel,
        out_shape=jax.ShapeDtypeStruct((B, 8, n_pad), jnp.float32),
        grid=grid,
        in_specs=[
            pl.BlockSpec((cout_pad, cin), lambda i, b: (0, 0)),    # weights resident
            pl.BlockSpec((cout_pad, 1), lambda i, b: (0, 0)),      # bias resident
            pl.BlockSpec((None, cin, tile_m), lambda i, b: (b, 0, i)),  # activations
            pl.BlockSpec((4, tile_m), lambda i, b: (0, i)),        # aux, batch-invar.
        ],
        out_specs=pl.BlockSpec((None, 8, tile_m), lambda i, b: (b, 0, i)),
        compiler_params=pltpu.CompilerParams(
            dimension_semantics=("parallel", "parallel")),
    )(wT, b_col, xTb, aux)


# -----------------------------------------------------------------------------
# Glue (plain JAX): coords_fmap2orig, layout-preserving flatten, top-k gather.
# -----------------------------------------------------------------------------
def coords_for_level(h, w, stride):
    shifts_x = jnp.arange(0, w * stride, stride, dtype=jnp.float32)
    shifts_y = jnp.arange(0, h * stride, stride, dtype=jnp.float32)
    sy, sx = jnp.meshgrid(shifts_y, shifts_x, indexing="ij")
    return jnp.stack([sx.reshape(-1), sy.reshape(-1)], axis=-1) + stride // 2


def init_params(key, batch, img_hw, cfg=DefaultConfig):
    cf = cfg.fpn_out_channels
    cout = cfg.class_num + 1 + 5 + cfg.theta_class_num + 1   # cls|cnt|reg(5)|tc|tr
    keys = jax.random.split(key, 2 + len(cfg.strides))
    w = jax.random.normal(keys[0], (cf, cout), jnp.float32) * 0.1
    b = jax.random.normal(keys[1], (1, cout), jnp.float32) * 0.1
    feats = []
    H, W = img_hw
    for i, s in enumerate(cfg.strides):
        h, w_ = max(H // s, 1), max(W // s, 1)
        feats.append(jax.random.normal(keys[2 + i], (batch, cf, h, w_), jnp.float32))
    return {"w": w, "b": b, "fpn_feats": feats}


def srdf_detector_inference(batch_imgs, params, cfg=DefaultConfig):
    B = batch_imgs.shape[0]
    cf = cfg.fpn_out_channels

    # ---- SRDF body ----
    # TODO(synk): resnet101 backbone / FPN / ClsCntRegHead conv towers were not
    # provided in the source; deterministic synthetic FPN features plus a shared
    # 1x1-conv head (fused into the Pallas kernel) stand in for SRDF.srdf_body.
    feat_list = params["fpn_feats"]        # list of NCHW [B, Cf, h_l, w_l]

    # NCHW is already channels-leading: layout-preserving reshape per level to
    # [B, Cf, h*w] (same row-major position order as the PyTorch permute+reshape),
    # bf16 cast fused per level, lane padding folded into the concat.
    xT_levels, cx_levels, cy_levels, st_levels = [], [], [], []
    N = 0
    for f, s in zip(feat_list, cfg.strides):
        b_, c_, h_, w_ = f.shape
        N += h_ * w_
        xT_levels.append(f.astype(jnp.bfloat16).reshape(b_, c_, h_ * w_))
        coord = coords_for_level(h_, w_, s)
        cx_levels.append(coord[:, 0])
        cy_levels.append(coord[:, 1])
        st_levels.append(jnp.full((h_ * w_,), float(s), jnp.float32))

    tile_m = _choose_tile_m(N)
    N_pad = _round_up(N, tile_m)
    pad = N_pad - N
    if pad:
        xT_levels.append(jnp.zeros((B, cf, pad), jnp.bfloat16))
        cx_levels.append(jnp.zeros((pad,), jnp.float32))
        cy_levels.append(jnp.zeros((pad,), jnp.float32))
        st_levels.append(jnp.ones((pad,), jnp.float32))

    xTb = jnp.concatenate(xT_levels, axis=-1)            # [B, Cf, N_pad] bf16
    valid = jnp.concatenate(
        [jnp.ones((N,), jnp.float32), jnp.zeros((pad,), jnp.float32)])
    aux = jnp.stack([jnp.concatenate(cx_levels),
                     jnp.concatenate(cy_levels),
                     jnp.concatenate(st_levels),
                     valid], axis=0)                      # [4, N_pad] f32

    cout = cfg.class_num + 1 + 5 + cfg.theta_class_num + 1
    cout_pad = _round_up(cout, 8)                         # sublane-aligned rows
    wT = jnp.zeros((cout_pad, cf), jnp.float32).at[:cout].set(params["w"].T)
    wT = wT.astype(jnp.bfloat16)
    b_col = jnp.zeros((cout_pad, 1), jnp.float32).at[:cout, 0].set(params["b"][0])

    packed = fused_head_decode(
        wT, b_col, xTb, aux, class_num=cfg.class_num,
        theta_class_num=cfg.theta_class_num, tile_m=tile_m)   # [B, 8, N_pad]

    scores = packed[:, 5, :]                              # [B, N_pad]
    classes = packed[:, 6, :].astype(jnp.int32)           # [B, N_pad]

    # torch.topk(..., largest=True, sorted=True) + per-batch gather; boxes are
    # gathered on the lane axis first (only max_num columns), then tiny transpose.
    max_num = min(cfg.max_detection_boxes_num, N)
    top_scores, top_idx = jax.lax.top_k(scores, max_num)
    top_classes = jnp.take_along_axis(classes, top_idx, axis=1)
    top_boxes = jnp.take_along_axis(packed[:, 0:5, :], top_idx[:, None, :], axis=2)
    top_boxes = jnp.transpose(top_boxes, (0, 2, 1))       # [B, max_num, 5]

    # TODO(synk): _post_process (score-threshold mask + nms_wrapper NMS) produces
    # data-dependent shapes and has no clean Pallas equivalent; we return the
    # sorted pre-NMS top-k detections for batch element 0, matching the inference
    # return structure (scores[0], classes[0], boxes[0]).
    return top_scores[0], top_classes[0], top_boxes[0]


if __name__ == "__main__":
    key = jax.random.PRNGKey(0)
    k_img, k_par = jax.random.split(key)
    batch_imgs = jax.random.normal(k_img, (2, 3, 128, 128), jnp.float32)  # NCHW
    params = init_params(k_par, batch_imgs.shape[0],
                         (batch_imgs.shape[2], batch_imgs.shape[3]))

    scores, classes, boxes = srdf_detector_inference(batch_imgs, params)
    jax.block_until_ready((scores, classes, boxes))

    max_num = DefaultConfig.max_detection_boxes_num
    assert scores.shape == (max_num,)
    assert classes.shape == (max_num,)
    assert boxes.shape == (max_num, 5)
    assert bool(jnp.all(jnp.isfinite(scores)))
    print("KERNEL_OK")
</pallas_src>

<mosaic_0001>
module attributes {stable_mosaic.version = 11 : i64} {
  func.func @_fused_head_decode_kernel(%arg0: i32, %arg1: i32, %arg2: memref<16x32xbf16, #tpu.memory_space<vmem>>, %arg3: memref<16x1xf32, #tpu.memory_space<vmem>>, %arg4: memref<1x32x512xbf16, #tpu.memory_space<vmem>>, %arg5: memref<4x512xf32, #tpu.memory_space<vmem>>, %arg6: memref<1x8x512xf32, #tpu.memory_space<vmem>>) attributes {dimension_semantics = [#tpu.dimension_semantics<parallel>, #tpu.dimension_semantics<parallel>], iteration_bounds = array<i64: 1, 2>, scalar_prefetch = 0 : i64, scratch_operands = 0 : i64, tpu.core_type = #tpu.core_type<tc>, window_params = [{pipeline_mode = #tpu.pipeline_mode<synchronous>, transform_indices = @transform_0, window_bounds = array<i64: 16, 32>}, {pipeline_mode = #tpu.pipeline_mode<synchronous>, transform_indices = @transform_1, window_bounds = array<i64: 16, 1>}, {transform_indices = @transform_2, window_bounds = array<i64: 1, 32, 512>}, {transform_indices = @transform_3, window_bounds = array<i64: 4, 512>}, {transform_indices = @transform_4, window_bounds = array<i64: 1, 8, 512>}]} {
    %c0 = arith.constant 0 : index
    %c0_0 = arith.constant 0 : index
    %0 = vector.load %arg2[%c0, %c0_0] : memref<16x32xbf16, #tpu.memory_space<vmem>>, vector<16x32xbf16>
    %c0_1 = arith.constant 0 : index
    %c0_2 = arith.constant 0 : index
    %1 = vector.load %arg3[%c0_1, %c0_2] : memref<16x1xf32, #tpu.memory_space<vmem>>, vector<16x1xf32>
    %2 = vector.shape_cast %1 : vector<16x1xf32> to vector<16x1xf32>
    %3 = vector.broadcast %2 : vector<16x1xf32> to vector<16x512xf32>
    %c0_i32 = arith.constant 0 : i32
    %c1_i32 = arith.constant 1 : i32
    %4 = arith.muli %c0_i32, %c1_i32 : i32
    %c0_i32_3 = arith.constant 0 : i32
    %5 = arith.addi %c0_i32_3, %4 : i32
    %c512_i32 = arith.constant 512 : i32
    %6 = arith.muli %5, %c512_i32 : i32
    %7 = tpu.assume_multiple %6, 512 : i32
    %c0_4 = arith.constant 0 : index
    %c0_5 = arith.constant 0 : index
    %8 = arith.index_cast %7 : i32 to index
    %9 = vector.load %arg4[%c0_4, %c0_5, %8] : memref<1x32x512xbf16, #tpu.memory_space<vmem>>, vector<1x32x512xbf16>
    %10 = vector.shape_cast %9 : vector<1x32x512xbf16> to vector<32x512xbf16>
    %cst = arith.constant dense<0.000000e+00> : vector<16x512xf32>
    %11 = tpu.matmul %0, %10, %cst {dimension_numbers = #tpu.dot_dimension_numbers<[1], [0], [0], [1], [0, 0, 1, 1], [], []>} : vector<16x32xbf16>, vector<32x512xbf16>, vector<16x512xf32> -> vector<16x512xf32>
    %12 = arith.addf %11, %3 : vector<16x512xf32>
    %c0_6 = arith.constant 0 : index
    %13 = arith.index_cast %7 : i32 to index
    %14 = vector.load %arg5[%c0_6, %13] : memref<4x512xf32, #tpu.memory_space<vmem>>, vector<2x512xf32>
    %c2 = arith.constant 2 : index
    %15 = arith.index_cast %7 : i32 to index
    %16 = vector.load %arg5[%c2, %15] : memref<4x512xf32, #tpu.memory_space<vmem>>, vector<1x512xf32>
    %c3 = arith.constant 3 : index
    %17 = arith.index_cast %7 : i32 to index
    %18 = vector.load %arg5[%c3, %17] : memref<4x512xf32, #tpu.memory_space<vmem>>, vector<1x512xf32>
    %cst_7 = arith.constant 5.000000e-01 : f32
    %19 = vector.broadcast %cst_7 : f32 to vector<1x512xf32>
    %20 = arith.cmpf ogt, %18, %19 : vector<1x512xf32>
    %21 = vector.extract_strided_slice %12 {offsets = [0, 0], sizes = [1, 512], strides = [1, 1]} : vector<16x512xf32> to vector<1x512xf32>
    %cst_8 = arith.constant 0.000000e+00 : f32
    %22 = vector.broadcast %cst_8 : f32 to vector<1x512xf32>
    %23 = vector.extract_strided_slice %12 {offsets = [1, 0], sizes = [1, 512], strides = [1, 1]} : vector<16x512xf32> to vector<1x512xf32>
    %24 = arith.cmpf ogt, %23, %21 : vector<1x512xf32>
    %25 = arith.select %24, %23, %21 : vector<1x512xi1>, vector<1x512xf32>
    %cst_9 = arith.constant 1.000000e+00 : f32
    %26 = vector.broadcast %cst_9 : f32 to vector<1x512xf32>
    %27 = arith.select %24, %26, %22 : vector<1x512xi1>, vector<1x512xf32>
    %28 = vector.extract_strided_slice %12 {offsets = [2, 0], sizes = [1, 512], strides = [1, 1]} : vector<16x512xf32> to vector<1x512xf32>
    %29 = arith.cmpf ogt, %28, %25 : vector<1x512xf32>
    %30 = arith.select %29, %28, %25 : vector<1x512xi1>, vector<1x512xf32>
    %cst_10 = arith.constant 2.000000e+00 : f32
    %31 = vector.broadcast %cst_10 : f32 to vector<1x512xf32>
    %32 = arith.select %29, %31, %27 : vector<1x512xi1>, vector<1x512xf32>
    %33 = vector.extract_strided_slice %12 {offsets = [3, 0], sizes = [1, 512], strides = [1, 1]} : vector<16x512xf32> to vector<1x512xf32>
    %34 = arith.cmpf ogt, %33, %30 : vector<1x512xf32>
    %35 = arith.select %34, %33, %30 : vector<1x512xi1>, vector<1x512xf32>
    %cst_11 = arith.constant 3.000000e+00 : f32
    %36 = vector.broadcast %cst_11 : f32 to vector<1x512xf32>
    %37 = arith.select %34, %36, %32 : vector<1x512xi1>, vector<1x512xf32>
    %38 = arith.negf %35 : vector<1x512xf32>
    %39 = math.exp %38 : vector<1x512xf32>
    %cst_12 = arith.constant 1.000000e+00 : f32
    %40 = vector.broadcast %cst_12 : f32 to vector<1x512xf32>
    %41 = arith.addf %40, %39 : vector<1x512xf32>
    %42 = arith.divf %40, %41 : vector<1x512xf32>
    %cst_13 = arith.constant -1.000000e+30 : f32
    %43 = vector.broadcast %cst_13 : f32 to vector<1x512xf32>
    %44 = arith.select %20, %42, %43 : vector<1x512xi1>, vector<1x512xf32>
    %cst_14 = arith.constant 1.000000e+00 : f32
    %45 = vector.broadcast %cst_14 : f32 to vector<1x512xf32>
    %46 = arith.addf %37, %45 : vector<1x512xf32>
    %47 = vector.extract_strided_slice %12 {offsets = [10, 0], sizes = [1, 512], strides = [1, 1]} : vector<16x512xf32> to vector<1x512xf32>
    %cst_15 = arith.constant 0.000000e+00 : f32
    %48 = vector.broadcast %cst_15 : f32 to vector<1x512xf32>
    %49 = vector.extract_strided_slice %12 {offsets = [11, 0], sizes = [1, 512], strides = [1, 1]} : vector<16x512xf32> to vector<1x512xf32>
    %50 = arith.cmpf ogt, %49, %47 : vector<1x512xf32>
    %51 = arith.select %50, %49, %47 : vector<1x512xi1>, vector<1x512xf32>
    %cst_16 = arith.constant 1.000000e+00 : f32
    %52 = vector.broadcast %cst_16 : f32 to vector<1x512xf32>
    %53 = arith.select %50, %52, %48 : vector<1x512xi1>, vector<1x512xf32>
    %54 = vector.extract_strided_slice %12 {offsets = [12, 0], sizes = [1, 512], strides = [1, 1]} : vector<16x512xf32> to vector<1x512xf32>
    %55 = arith.cmpf ogt, %54, %51 : vector<1x512xf32>
    %cst_17 = arith.constant 2.000000e+00 : f32
    %56 = vector.broadcast %cst_17 : f32 to vector<1x512xf32>
    %57 = arith.select %55, %56, %53 : vector<1x512xi1>, vector<1x512xf32>
    %cst_18 = arith.constant 1.000000e+00 : f32
    %58 = vector.broadcast %cst_18 : f32 to vector<1x512xf32>
    %59 = arith.addf %57, %58 : vector<1x512xf32>
    %cst_19 = arith.constant 1.000000e+01 : f32
    %60 = vector.broadcast %cst_19 : f32 to vector<1x512xf32>
    %61 = arith.mulf %59, %60 : vector<1x512xf32>
    %62 = vector.extract_strided_slice %12 {offsets = [13, 0], sizes = [1, 512], strides = [1, 1]} : vector<16x512xf32> to vector<1x512xf32>
    %63 = arith.addf %61, %62 : vector<1x512xf32>
    %64 = vector.extract_strided_slice %12 {offsets = [5, 0], sizes = [2, 512], strides = [1, 1]} : vector<16x512xf32> to vector<2x512xf32>
    %65 = vector.broadcast %16 : vector<1x512xf32> to vector<2x512xf32>
    %66 = arith.mulf %64, %65 : vector<2x512xf32>
    %67 = vector.extract_strided_slice %12 {offsets = [7, 0], sizes = [2, 512], strides = [1, 1]} : vector<16x512xf32> to vector<2x512xf32>
    %68 = vector.broadcast %16 : vector<1x512xf32> to vector<2x512xf32>
    %69 = arith.mulf %67, %68 : vector<2x512xf32>
    %70 = arith.subf %14, %66 : vector<2x512xf32>
    %cst_20 = arith.constant 0.000000e+00 : f32
    %71 = vector.shape_cast %20 : vector<1x512xi1> to vector<1x512xi1>
    %72 = vector.broadcast %71 : vector<1x512xi1> to vector<2x512xi1>
    %73 = vector.broadcast %cst_20 : f32 to vector<2x512xf32>
    %74 = arith.select %72, %70, %73 : vector<2x512xi1>, vector<2x512xf32>
    %75 = arith.addf %14, %69 : vector<2x512xf32>
    %cst_21 = arith.constant 0.000000e+00 : f32
    %76 = vector.shape_cast %20 : vector<1x512xi1> to vector<1x512xi1>
    %77 = vector.broadcast %76 : vector<1x512xi1> to vector<2x512xi1>
    %78 = vector.broadcast %cst_21 : f32 to vector<2x512xf32>
    %79 = arith.select %77, %75, %78 : vector<2x512xi1>, vector<2x512xf32>
    %cst_22 = arith.constant 0.000000e+00 : f32
    %80 = vector.broadcast %cst_22 : f32 to vector<1x512xf32>
    %81 = arith.select %20, %63, %80 : vector<1x512xi1>, vector<1x512xf32>
    %c0_23 = arith.constant 0 : index
    %c0_24 = arith.constant 0 : index
    %82 = arith.index_cast %7 : i32 to index
    %83 = vector.load %arg6[%c0_23, %c0_24, %82] : memref<1x8x512xf32, #tpu.memory_space<vmem>>, vector<1x2x512xf32>
    %84 = vector.shape_cast %83 : vector<1x2x512xf32> to vector<2x512xf32>
    %85 = vector.shape_cast %74 : vector<2x512xf32> to vector<1x2x512xf32>
    tpu.vector_store %arg6[%c0_23, %c0_24, %82], %85 {strides = array<i32>} : memref<1x8x512xf32, #tpu.memory_space<vmem>>, vector<1x2x512xf32>,
    %c0_25 = arith.constant 0 : index
    %c2_26 = arith.constant 2 : index
    %86 = arith.index_cast %7 : i32 to index
    %87 = vector.load %arg6[%c0_25, %c2_26, %86] : memref<1x8x512xf32, #tpu.memory_space<vmem>>, vector<1x2x512xf32>
    %88 = vector.shape_cast %87 : vector<1x2x512xf32> to vector<2x512xf32>
    %89 = vector.shape_cast %79 : vector<2x512xf32> to vector<1x2x512xf32>
    tpu.vector_store %arg6[%c0_25, %c2_26, %86], %89 {strides = array<i32>} : memref<1x8x512xf32, #tpu.memory_space<vmem>>, vector<1x2x512xf32>,
    %c0_27 = arith.constant 0 : index
    %c4 = arith.constant 4 : index
    %90 = arith.index_cast %7 : i32 to index
    %91 = vector.load %arg6[%c0_27, %c4, %90] : memref<1x8x512xf32, #tpu.memory_space<vmem>>, vector<1x1x512xf32>
    %92 = vector.shape_cast %91 : vector<1x1x512xf32> to vector<1x512xf32>
    %93 = vector.shape_cast %81 : vector<1x512xf32> to vector<1x1x512xf32>
    tpu.vector_store %arg6[%c0_27, %c4, %90], %93 {strides = array<i32>} : memref<1x8x512xf32, #tpu.memory_space<vmem>>, vector<1x1x512xf32>,
    %c0_28 = arith.constant 0 : index
    %c5 = arith.constant 5 : index
    %94 = arith.index_cast %7 : i32 to index
    %95 = vector.load %arg6[%c0_28, %c5, %94] : memref<1x8x512xf32, #tpu.memory_space<vmem>>, vector<1x1x512xf32>
    %96 = vector.shape_cast %95 : vector<1x1x512xf32> to vector<1x512xf32>
    %97 = vector.shape_cast %44 : vector<1x512xf32> to vector<1x1x512xf32>
    tpu.vector_store %arg6[%c0_28, %c5, %94], %97 {strides = array<i32>} : memref<1x8x512xf32, #tpu.memory_space<vmem>>, vector<1x1x512xf32>,
    %c0_29 = arith.constant 0 : index
    %c6 = arith.constant 6 : index
    %98 = arith.index_cast %7 : i32 to index
    %99 = vector.load %arg6[%c0_29, %c6, %98] : memref<1x8x512xf32, #tpu.memory_space<vmem>>, vector<1x1x512xf32>
    %100 = vector.shape_cast %99 : vector<1x1x512xf32> to vector<1x512xf32>
    %101 = vector.shape_cast %46 : vector<1x512xf32> to vector<1x1x512xf32>
    tpu.vector_store %arg6[%c0_29, %c6, %98], %101 {strides = array<i32>} : memref<1x8x512xf32, #tpu.memory_space<vmem>>, vector<1x1x512xf32>,
    %cst_30 = arith.constant 0.000000e+00 : f32
    %102 = vector.broadcast %cst_30 : f32 to vector<1x512xf32>
    %c0_31 = arith.constant 0 : index
    %c7 = arith.constant 7 : index
    %103 = arith.index_cast %7 : i32 to index
    %104 = vector.load %arg6[%c0_31, %c7, %103] : memref<1x8x512xf32, #tpu.memory_space<vmem>>, vector<1x1x512xf32>
    %105 = vector.shape_cast %104 : vector<1x1x512xf32> to vector<1x512xf32>
    %106 = vector.shape_cast %102 : vector<1x512xf32> to vector<1x1x512xf32>
    tpu.vector_store %arg6[%c0_31, %c7, %103], %106 {strides = array<i32>} : memref<1x8x512xf32, #tpu.memory_space<vmem>>, vector<1x1x512xf32>,
    %c1_i32_32 = arith.constant 1 : i32
    return
  }
  func.func @transform_0(%arg0: i32, %arg1: i32) -> (i32, i32) {
    %c0_i32 = arith.constant 0 : i32
    %c0_i32_0 = arith.constant 0 : i32
    %c0_i32_1 = arith.constant 0 : i32
    return %c0_i32, %c0_i32_0 : i32, i32
  }
  func.func @transform_1(%arg0: i32, %arg1: i32) -> (i32, i32) {
    %c0_i32 = arith.constant 0 : i32
    %c0_i32_0 = arith.constant 0 : i32
    %c0_i32_1 = arith.constant 0 : i32
    return %c0_i32, %c0_i32_0 : i32, i32
  }
  func.func @transform_2(%arg0: i32, %arg1: i32) -> (i32, i32, i32) {
    %c0_i32 = arith.constant 0 : i32
    %c0_i32_0 = arith.constant 0 : i32
    return %arg1, %c0_i32, %arg0 : i32, i32, i32
  }
  func.func @transform_3(%arg0: i32, %arg1: i32) -> (i32, i32) {
    %c0_i32 = arith.constant 0 : i32
    %c0_i32_0 = arith.constant 0 : i32
    return %c0_i32, %arg0 : i32, i32
  }
  func.func @transform_4(%arg0: i32, %arg1: i32) -> (i32, i32, i32) {
    %c0_i32 = arith.constant 0 : i32
    %c0_i32_0 = arith.constant 0 : i32
    return %arg1, %c0_i32, %arg0 : i32, i32, i32
  }
}

</mosaic_0001>

<bundles_post_ra>
// kernel: tpu_custom_call.1
= control target key start
LH: loop header
LB: loop body
LE: loop exit
PB: predicated region body
PF: predicated region fallthrough
CT: control target
= control target key end

     0   :  { %9 = vsyncpa [#allocation3], 0  ;;  %s1668_s0 = inlined_call_operand.vmem [shape: bf16[16,32], index: 0, kind: input, shape index: {}]   ;;  %s1669_s1 = inlined_call_operand.vmem [shape: f32[16,1], index: 1, kind: input, shape index: {}]   ;;  %s1670_s2 = inlined_call_operand.hbm [shape: bf16[2,32,512], index: 2, kind: input, shape index: {}]   ;;  %s1671_s3 = inlined_call_operand.vmem [shape: f32[4,512], index: 3, kind: input, shape index: {}]   ;;  %s1672_s4 = inlined_call_operand.hbm [shape: f32[2,8,512], index: 4, kind: output, shape index: {}]  }
   0x1   :  { %11 = vsyncpa [#allocation3 + $0x1], 0 }
   0x2   :  { %12 = vsyncpa [#allocation4], 0 }
   0x3   :  { %14 = vsyncpa [#allocation4 + $0x1], 0  ;;  %s1257_s15 = smov 0   ;;  %s1259_s16 = smov 0  }
   0x4   :  { %s1261_s17 = smov 0   ;;  %s1263_s18 = smov 0  }
   0x5   :  { %s1265_s19 = smov 0   ;;  %s1267_s20 = smov 0  }
   0x6 LB: > { %s971_s21 = sadd.s32 4294967295, %s1223_s20   ;;  %s972_s22 = sadd.s32 4294967294, %s1223_s20   ;;  %s1223_s20 = sphi %s1267_s20, %s20_s20   ;;  %s1219_s19 = sphi %s1265_s19, %s1693_s19   ;;  %s1215_s18 = sphi %s1263_s18, %s1692_s18   ;;  %s1211_s17 = sphi %s1261_s17, %s1691_s17   ;;  %s1207_s16 = sphi %s1259_s16, %s1690_s16   ;;  %s1203_s15 = sphi %s1257_s15, %s1689_s15  }
   0x7   : > { %s29_s23 = sadd.s32 1, %s1219_s19  ;;  %s83_s24 = sadd.s32 1, %s1211_s17 }
   0x8   : > { %p30_p0 = scmp.ge.s32.totalorder %s29_s23, 2  ;;  %p90_p1 = scmp.ne.s32.totalorder %s1211_s17, %s1207_s16 }
   0x9   : > { %p91_p2 = scmp.eq.s32.totalorder %s1223_s20, 0  ;;  %p96_p3 = scmp.ne.s32.totalorder %s1207_s16, %s1203_s15 }
   0xa   : > { %s1695_s23 = smov (%p30_p0, %s29_s23), 0  ;;  %p97_p5 = scmp.eq.s32.totalorder %s971_s21, 0 }
   0xb   : > { %p1298_p4 = por %p91_p2, %p90_p1  ;;  %s78_s26 = ssub.s32 %s1219_s19, %s1695_s23 }
   0xc   : > { %p148_p6 = scmp.eq.s32.totalorder %s971_s21, 1  ;;  %p81_p7 = scmp.eq.s32.totalorder %s78_s26, 0 }
   0xd   : > { %p1304_p8 = por %p97_p5, %p96_p3  ;;  %p154_p10 = scmp.eq.s32.totalorder %s972_s22, 1 }
   0xe   : > { %p1308_p9 = por %p148_p6, %p90_p1  ;;  %p1026_p13 = scmp.lt.s32.totalorder %s1223_s20, 2 }
   0xf   : > { %s1313_s29 = scalar_select %p81_p7, %s1211_s17, %s83_s24  }
  0x10   : > { %s1676_s28 = scalar_select %p1308_p9, 1, 0 }
  0x11   : > { %p1315_p11 = por %p154_p10, %p96_p3  ;;  %s189_s5 = sand.u32 1, %s1211_s17  }
  0x12   : > { %s976_s6 = sshll.u32 %s189_s5, 6  ;;  %s1012_s7 = sshll.u32 %s1219_s19, 10 }
  0x13   : > { %s1677_s30 = scalar_select %p1315_p11, 1, 0 }
  0x14   : > { %s1326_s10 = scalar_lea.hbm %s1670_s2, %s1012_s7  ;;  %s193_s11 = scalar_lea.vmem [#allocation2], %s976_s6 }
  0x15   : > { %s202_s12 = sshll.u32 %s193_s11, 4  ;;  %p1332_p0 = pnand %p1026_p13, %p1298_p4  ;;  %s1328_s12 = int_to_ptr.vmem [resolvable:$true] %s202_s12 }
  0x16   : > { %s1337_s14 = scalar_lea.sflag [#allocation3], %s189_s5  ;;  %s1111_s21 = scalar_lea.hbm %s1326_s10, 1024 }
  0x17   : > { %p1112_p2 = scmp.ne.s32.totalorder %s1326_s10, %s1111_s21  ;;  %p1113_p3 = pneg %p1332_p0 }
  0x18   : > { %s1116_s25 = scalar_lea.hbm %s1670_s2, 2048  ;;  %p1117_p4 = scmp.lt.u32.totalorder %s1326_s10, %s1670_s2 }
  0x19   : > { %p1114_p5 = pnand %p1113_p3, %p1112_p2  ;;  %p1118_p7 = scmp.lt.u32.totalorder %s1116_s25, %s1111_s21 }
  0x1a   : > { %p1120_p13 = scmp.lt.u32.totalorder %s1111_s21, %s1326_s10 }
  0x1b   : > { %p1115_p6 = pneg %p1114_p5  ;;  %p1119_p10 = por %p1118_p7, %p1117_p4 }
  0x1d   : > { %p1121_p12 = por %p1120_p13, %p1119_p10 }
  0x1f   : > { %p1122_p1 = pnand %p1121_p12, %p1115_p6 }
  0x21   : > { %1125 = shalt.err (!%p1122_p1)
}
  0x22   : > { %s1126_s5 = scalar_lea.vmem %s1328_s12, 1024  ;;  %s1225_s7 = smov [#allocation2]  }
  0x23   : > { %p1127_p2 = scmp.ne.s32.totalorder %s1328_s12, %s1126_s5  ;;  %s1131_s8 = sshll.u32 %s1225_s7, 4  ;;  %s1132_s8 = int_to_ptr.vmem [resolvable:$false] %s1131_s8 }
  0x24   : > { %s1133_s9 = scalar_lea.vmem %s1132_s8, 2048  ;;  %p1134_p9 = scmp.lt.s32.totalorder %s1328_s12, %s1132_s8 }
  0x25   : > { %p1129_p5 = pnand %p1127_p2, %p1113_p3  ;;  %p1135_p4 = scmp.lt.s32.totalorder %s1133_s9, %s1126_s5 }
  0x27   : > { %p1130_p11 = pneg %p1129_p5  ;;  %p1136_p7 = por %p1135_p4, %p1134_p9 }
  0x29   : > { %p1137_p10 = pnand %p1136_p7, %p1130_p11 }
  0x2b   : > { %1140 = shalt.err (!%p1137_p10)
}
  0x2c   : > { %s1226_s11 = smov 256   ;;  %s1227_s21 = smov 16  }
  0x2d   : > { %1021 = dma.hbm_to_vmem [thread:$0]  (!%p1332_p0), %s1326_s10, 1024, %s1328_s12, %s1337_s14, %s1226_s11, %s1226_s11, %s1227_s21  }
  0x2e   : > { %p210_p12 = scmp.lt.s32.totalorder %s1223_s20, 3  ;;  %p1679_p1 = scmp.ge.s32.totalorder %s1223_s20, 1 }
  0x30   : > { %p211_p3 = pnand %p1679_p1, %p210_p12 }
  0x31   : > { %s1369_s22 = sand.u32 (!%p211_p3), 1, %s1207_s16  }
  0x32   : > { %214 = sbr.rel (%p211_p3) target bundleno = 354 (0x162), region = 36  ;;  %s980_s24 = sshll.u32 (!%p211_p3), %s1369_s22, 6 }
  0x33   : > { %s217_s25 = scalar_lea.sflag (!%p211_p3), [#allocation3], %s1369_s22  ;;  %s220_s26 = scalar_lea.vmem (!%p211_p3), [#allocation2], %s980_s24 }
  0x39   : > { %1194 = dma.done.wait (%p1304_p8), %s217_s25, 1024  }
  0x3a   : > { %1196 = vsyncadd (%p1304_p8), %s217_s25, 4294966272  ;;  %s981_s10 = sshll.u32 %s1369_s22, 5  ;;  %v552_v0 = vlaneseq  ;;  %v1228_v1 = vmov 0   ;;  %v1229_v3 = vmov 0.0   ;;  %v1082_v4 = vld [vmem:[%s220_s26 + $0x4] ss:$16 sps:$4 sm:$0xff]  }
  0x3b   : > { %362 = vmatprep.mubr.bf16.mxu0 %v1228_v1  ;;  %405 = vmatprep.mubr.bf16.mxu1 %v1228_v1  ;;  %s1382_s12 = scalar_lea.vmem [#allocation5], %s981_s10  ;;  %v1084_v5 = vld [vmem:[%s220_s26 + $0xc] ss:$16 sps:$4 sm:$0xff]   ;;  %v1086_v7 = vld [vmem:[%s220_s26] ss:$16 sps:$4 sm:$0xff]   ;;  %vm326_vm2 = vcmask 261120  }
  0x3c   : > { %vm1378_vm0 = vcmp.lt.s32.totalorder %v552_v0, 512  ;;  %1081 = vset.pattern.permute.xlu0 %v1228_v1  ;;  %v1388_v6 = vshrl.u32 %v552_v0, 7  ;;  %330 = vmatprep.subr.bf16.mxu0 %v1082_v4  ;;  %v1087_v8 = vld [vmem:[%s220_s26 + $0x8] ss:$16 sps:$4 sm:$0xff]   ;;  %v1088_v9 = vld [vmem:[%s220_s26 + $0x24] ss:$16 sps:$4 sm:$0xff]  }
  0x3d   : > { %1006 = vst.msk [vmem:[%s1382_s12 + $0x7] ss:$8 sm:$0xf] %vm1378_vm0, %v1229_v3  ;;  %373 = vmatprep.subr.bf16.mxu1 %v1084_v5  ;;  %331 = vmatpush1.bf16.msra.mxu0 %v1086_v7  ;;  %v1090_v10 = vld [vmem:[%s220_s26 + $0x2c] ss:$16 sps:$4 sm:$0xff]   ;;  %v261_v16 = vld [vmem:[%s1669_s1] sm:$0xff] }
  0x3e   : > { %374 = vmatpush1.bf16.msra.mxu1 %v1087_v8  ;;  %v1092_v11 = vld [vmem:[%s220_s26 + $0x20] ss:$16 sps:$4 sm:$0xff]   ;;  %332 = vmatprep.subr.bf16.mxu0 %v1088_v9  ;;  %v1093_v12 = vld [vmem:[%s220_s26 + $0x28] ss:$16 sps:$4 sm:$0xff]   ;;  %v657_v13 = vsub.s32 0, %v1388_v6  ;;  %v661_v14 = vsub.s32 1, %v1388_v6 }
  0x3f   : > { %375 = vmatprep.subr.bf16.mxu1 %v1090_v10  ;;  %v1395_v15 = vld [vmem:[%s1671_s3 + $0x3] ss:$4 sm:$0xf]  ;;  %v665_v17 = vsub.s32 2, %v1388_v6  ;;  %v669_v18 = vsub.s32 3, %v1388_v6  ;;  %265 = vperm.xlu0 %1081, %v261_v16   ;;  %s1013_s27 = sshll.u32 %s1215_s18, 9 }
  0x40   : > { %vm422_vm1 = vcmp.gt.f32.partialorder %v1395_v15, 0.5  ;;  %v1094_v19 = vld [vmem:[%s1668_s0] sm:$0xff]   ;;  %v262_v25 = vld [vmem:[%s1669_s1 + $0x8] sm:$0xff]  ;;  %v1230_v28 = vmov 1966171168   ;;  %s872_s13 = sshll.u32 %s1382_s12, 4  ;;  %s1614_s5 = scalar_lea.hbm %s1672_s4, %s1013_s27  ;;  %s1616_s13 = int_to_ptr.vmem [resolvable:$true] %s872_s13 }
  0x41   : > { %333 = vmatpush1.bf16.msra.mxu0 %v1092_v11  ;;  %v697_v20 = vsel %vm422_vm1, 1, %v1228_v1  ;;  %v993_v27 = vld [vmem:[%s1671_s3 + $0x2] ss:$4 sm:$0xf]  ;;  %v550_v29 = vunpack.c.l.s4 %v1230_v28  ;;  %s856_s18 = scalar_lea.sflag [#allocation4], %s1369_s22  ;;  %s1141_s7 = scalar_lea.vmem %s1616_s13, 512 }
  0x42   : > { %376 = vmatpush1.bf16.msra.mxu1 %v1093_v12  ;;  %v1408_v21 = vrot.slane %v697_v20, %v657_v13  ;;  %v1410_v22 = vrot.slane %v697_v20, %v661_v14  ;;  %v1412_v23 = vrot.slane %v697_v20, %v665_v17  ;;  %v1414_v24 = vrot.slane %v697_v20, %v669_v18  ;;  %p1142_p8 = scmp.ne.s32.totalorder %s1616_s13, %s1141_s7  ;;  %p1686_p9 = scmp.ne.s32.totalorder %s1676_s28, 0 }
  0x43   : > { %270 = vperm.xlu0 %1081, %v262_v25   ;;  %v1422_v30 = vrot.slane %v993_v27, %v657_v13  ;;  %v1424_v31 = vrot.slane %v993_v27, %v665_v17  ;;  %v1428_v33 = vrot.slane %v993_v27, %v661_v14  ;;  %v1430_v34 = vrot.slane %v993_v27, %v669_v18  ;;  %s1231_s8 = smov [#allocation5]  }
  0x44   : > { %991 = vmatmul.mubr.msk.bf16.vlgmr.msra.gmra.mrb[0].mxu0 %vm326_vm2, %v1094_v19  ;;  %v551_v37 = vunpack.c.0.s8 %v550_v29  ;;  %p1143_p11 = pnand %p1142_p8, %p1686_p9  ;;  %s1145_s9 = sshll.u32 %s1231_s8, 4  ;;  %s1146_s9 = int_to_ptr.vmem [resolvable:$false] %s1145_s9 }
  0x45   : > { %992 = vmatmul.mubr.msk.bf16.vlgmr.msra.gmra.mrb[0].mxu1 %vm326_vm2, %v1094_v19  ;;  %s1147_s11 = scalar_lea.vmem %s1146_s9, 1024  ;;  %p1148_p6 = scmp.lt.s32.totalorder %s1616_s13, %s1146_s9 }
  0x46   : > { %v1457_v56 = vsub.s32 %v551_v37, %v1388_v6  ;;  %p1144_p0 = pneg %p1143_p11  ;;  %p1149_p13 = scmp.lt.s32.totalorder %s1147_s11, %s1141_s7 }
  0x48   : > { %p1150_p2 = por %p1149_p13, %p1148_p6 }
  0x4a   : > { %p1151_p5 = pnand %p1150_p2, %p1144_p0 }
  0xbe   : > { %v266_v26 = vpop.permute.xlu0 %265 }
  0xc2   : > { %v1426_v32 = vpop.permute.xlu0 %270 }
 0x117   : > { %v364_v35 = vpop.f32.mrb[0].mxu0 }
 0x118   : > { %v407_v36 = vpop.f32.mrb[0].mxu1  ;;  %v365_v38 = vadd.f32 %v364_v35, %v266_v26  ;;  %v366_v40 = vpop.f32.mrb[1].mxu0 }
 0x119   : > { %v408_v39 = vadd.f32 %v407_v36, %v266_v26  ;;  %v409_v41 = vpop.f32.mrb[1].mxu1  ;;  %v1432_v42 = vadd.f32 %v366_v40, %v266_v26  ;;  %v368_v44 = vpop.f32.mrb[2].mxu0 }
 0x11a   : > { %v1434_v43 = vadd.f32 %v409_v41, %v266_v26  ;;  %v411_v45 = vpop.f32.mrb[2].mxu1  ;;  %v427_v46 = vrot.slane %v365_v38, 7  ;;  %v1437_v47 = vmul.f32 %v1422_v30, %v365_v38  ;;  %v1442_v50 = vpop.f32.mrb[3].mxu0  ;;  %v1460_v57 = vadd.f32 %v368_v44, %v1426_v32 }
 0x11b   : > { %v429_v48 = vrot.slane %v408_v39, 7  ;;  %v1440_v49 = vmul.f32 %v1424_v31, %v408_v39  ;;  %v1444_v51 = vpop.f32.mrb[3].mxu1  ;;  %v428_v52 = vrot.slane %v1432_v42, 7  ;;  %v1449_v53 = vmul.f32 %v1428_v33, %v1432_v42 }
 0x11c   : > { %v430_v54 = vrot.slane %v1434_v43, 7  ;;  %v1454_v55 = vmul.f32 %v1430_v34, %v1434_v43  ;;  %vm435_vm3 = vcmp.gt.f32.partialorder %v365_v38, %v427_v46  ;;  %v582_v5 = vrot.slane %v1460_v57, 7 }
 0x11d   : > { %vm437_vm4 = vcmp.gt.f32.partialorder %v408_v39, %v429_v48  ;;  %v439_v58 = vsel %vm435_vm3, %v365_v38, %v427_v46  ;;  %v443_v59 = vsel %vm435_vm3, 1.0, %v1229_v3  ;;  %vm436_vm5 = vcmp.gt.f32.partialorder %v1432_v42, %v428_v52 }
 0x11e   : > { %v441_v60 = vsel %vm437_vm4, %v408_v39, %v429_v48  ;;  %v445_v61 = vsel %vm437_vm4, 1.0, %v1229_v3  ;;  %v451_v62 = vrot.slane %v439_v58, 7  ;;  %v471_v63 = vrot.slane %v443_v59, 7 }
 0x11f   : > { %v453_v0 = vrot.slane %v441_v60, 7  ;;  %v473_v1 = vrot.slane %v445_v61, 7  ;;  %vm1466_vm6 = vcmp.gt.f32.partialorder %v1434_v43, %v430_v54  ;;  %v1472_v6 = vadd.f32 %v411_v45, %v1426_v32 }
 0x120   : > { %vm459_vm7 = vcmp.gt.f32.partialorder %v365_v38, %v451_v62  ;;  %v440_v7 = vsel %vm436_vm5, %v1432_v42, %v428_v52  ;;  %v444_v8 = vsel %vm436_vm5, 1.0, %v1229_v3  ;;  %v442_v19 = vsel %vm1466_vm6, %v1434_v43, %v430_v54 }
 0x121   : > { %vm461_vm8 = vcmp.gt.f32.partialorder %v408_v39, %v453_v0  ;;  %v463_v9 = vsel %vm459_vm7, %v365_v38, %v451_v62  ;;  %v479_v10 = vsel %vm459_vm7, 2.0, %v471_v63  ;;  %v452_v18 = vrot.slane %v440_v7, 7 }
 0x122   : > { %v465_v11 = vsel %vm461_vm8, %v408_v39, %v453_v0  ;;  %v481_v12 = vsel %vm461_vm8, 2.0, %v473_v1  ;;  %v487_v13 = vrot.slane %v463_v9, 7  ;;  %v507_v14 = vrot.slane %v479_v10, 7 }
 0x123   : > { %v489_v16 = vrot.slane %v465_v11, 7  ;;  %v509_v17 = vrot.slane %v481_v12, 7  ;;  %v446_v20 = vsel %vm1466_vm6, 1.0, %v1229_v3  ;;  %v642_v25 = vrot.slane %v1460_v57, 1 }
 0x124   : > { %vm495_vm9 = vcmp.gt.f32.partialorder %v365_v38, %v487_v13  ;;  %v472_v26 = vrot.slane %v444_v8, 7  ;;  %v454_v27 = vrot.slane %v442_v19, 7  ;;  %v474_v36 = vrot.slane %v446_v20, 7 }
 0x125   : > { %vm497_vm10 = vcmp.gt.f32.partialorder %v408_v39, %v489_v16  ;;  %v499_v28 = vsel %vm495_vm9, %v365_v38, %v487_v13  ;;  %v515_v29 = vsel %vm495_vm9, 3.0, %v507_v14  ;;  %vm460_vm11 = vcmp.gt.f32.partialorder %v1432_v42, %v452_v18 }
 0x126   : > { %v501_v35 = vsel %vm497_vm10, %v408_v39, %v489_v16  ;;  %v995_v37 = vmul.f32 -1.442695, %v499_v28  ;;  %v574_v40 = vadd.f32 1.0, %v515_v29  ;;  %v517_v41 = vsel %vm497_vm10, 3.0, %v509_v17 }
 0x127   : > { %v997_v44 = vmul.f32 -1.442695, %v501_v35  ;;  %vm462_vm12 = vcmp.gt.f32.partialorder %v1434_v43, %v454_v27  ;;  %vm590_vm13 = vcmp.gt.f32.partialorder %v1460_v57, %v582_v5  ;;  %v1488_v45 = vmul.f32 %v1422_v30, %v1460_v57 }
 0x128   : > { %1095 = vpow2.f32 %v995_v37  ;;  %v464_v38 = vsel %vm460_vm11, %v1432_v42, %v452_v18  ;;  %v480_v46 = vsel %vm460_vm11, 2.0, %v472_v26  ;;  %v466_v39 = vsel %vm462_vm12, %v1434_v43, %v454_v27 }
 0x129   : > { %1097 = vpow2.f32 %v997_v44  ;;  %v488_v48 = vrot.slane %v464_v38, 7  ;;  %v508_v52 = vrot.slane %v480_v46, 7  ;;  %v482_v54 = vsel %vm462_vm12, 2.0, %v474_v36 }
 0x12a   : > { %v490_v58 = vrot.slane %v466_v39, 7  ;;  %v510_v59 = vrot.slane %v482_v54, 7  ;;  %v594_v60 = vsel %vm590_vm13, %v1460_v57, %v582_v5  ;;  %v598_v61 = vsel %vm590_vm13, 1.0, %v1229_v3 }
 0x12b   : > { %vm496_vm14 = vcmp.gt.f32.partialorder %v1432_v42, %v488_v48  ;;  %v606_v30 = vrot.slane %v594_v60, 7  ;;  %v622_v62 = vrot.slane %v598_v61, 7  ;;  %v584_v63 = vrot.slane %v1472_v6, 7 }
 0x12c   : > { %v576_v0 = vadd.f32 1.0, %v517_v41  ;;  %v500_v1 = vsel %vm496_vm14, %v1432_v42, %v488_v48  ;;  %v516_v4 = vsel %vm496_vm14, 3.0, %v508_v52  ;;  %vm498_vm15 = vcmp.gt.f32.partialorder %v1434_v43, %v490_v58 }
 0x12d   : > { %v996_v7 = vmul.f32 -1.442695, %v500_v1  ;;  %v575_v8 = vadd.f32 1.0, %v516_v4  ;;  %v502_v9 = vsel %vm498_vm15, %v1434_v43, %v490_v58  ;;  %v518_v10 = vsel %vm498_vm15, 3.0, %v510_v59 }
 0x12e   : > { %v998_v5 = vmul.f32 -1.442695, %v502_v9  ;;  %v577_v11 = vadd.f32 1.0, %v518_v10  ;;  %vm614_vm2 = vcmp.gt.f32.partialorder %v1460_v57, %v606_v30  ;;  %vm592_vm3 = vcmp.gt.f32.partialorder %v1472_v6, %v584_v63 }
 0x12f   : > { %vm714_vm4 = vcmp.eq.s32.totalorder %v1408_v21, 1  ;;  %1099 = vpow2.f32 %v996_v7  ;;  %v823_v12 = vcombine.low %v574_v40, %v575_v8  ;;  %v630_v13 = vsel %vm614_vm2, 2.0, %v622_v62 }
 0x130   : > { %v596_v42 = vsel %vm592_vm3, %v1472_v6, %v584_v63  ;;  %vm734_vm5 = vcmask 1040384   ;;  %1101 = vpow2.f32 %v998_v5  ;;  %v824_v14 = vcombine.low %v576_v0, %v577_v11 }
 0x131   : > { %v634_v16 = vadd.f32 1.0, %v630_v13  ;;  %v600_v43 = vsel %vm592_vm3, 1.0, %v1229_v3  ;;  %vm715_vm6 = vcmp.eq.s32.totalorder %v1410_v22, 1  ;;  %v831_v17 = vrot.slane %v823_v12, %v1457_v56 }
 0x132   : > { %v608_v18 = vrot.slane %v596_v42, 7  ;;  %v624_v19 = vrot.slane %v600_v43, 7  ;;  %v1508_v20 = vmul.f32 %v1424_v31, %v1472_v6  ;;  %v1096_v26 = vpop.eup %1095  ;;  %v838_v27 = vrot.slane %v824_v14, %v1457_v56  ;;  %v417_v42 = vld [vmem:[%s1671_s3 + $0x8] sm:$0x33] }
 0x133   : > { %v638_v28 = vmul.f32 10.0, %v634_v16  ;;  %v1513_v29 = vadd.f32 %v1442_v50, %v1426_v32  ;;  %v687_v35 = vcombine.high %v1437_v47, %v1449_v53  ;;  %v1098_v36 = vpop.eup %1097  ;;  %v531_v37 = vadd.f32 1.0, %v1096_v26 }
 0x134   : > { %vm616_vm7 = vcmp.gt.f32.partialorder %v1472_v6, %v608_v18  ;;  %v1520_v40 = vadd.f32 %v1444_v51, %v1426_v32  ;;  %v1524_v31 = vcombine.high %v1440_v49, %v1454_v55  ;;  %v533_v41 = vadd.f32 1.0, %v1098_v36  ;;  %v416_v32 = vld [vmem:[%s1671_s3] sm:$0x33] }
 0x135   : > { %v839_v44 = vcombine.high %v831_v17, %v838_v27  ;;  %v632_v38 = vsel %vm616_vm7, 2.0, %v624_v19  ;;  %vm735_vm8 = vcmask 1044484   ;;  %v1528_v50 = vadd.f32 %v642_v25, %v638_v28 }
 0x136   : > { %v636_v47 = vadd.f32 1.0, %v632_v38  ;;  %v644_v53 = vrot.slane %v1472_v6, 1  ;;  %v583_v51 = vrot.slane %v1513_v29, 7  ;;  %1103 = vrcp.f32 %v531_v37  ;;  %vm1552_vm12 = vmor %vm734_vm5, %vm735_vm8 }
 0x137   : > { %v846_v49 = vrot.slane %v839_v44, %v1457_v56  ;;  %v680_v55 = vmul.f32 %v1428_v33, %v1513_v29  ;;  %v999_v46 = vrot.slane %v687_v35, 9  ;;  %1105 = vrcp.f32 %v533_v41 }
 0x138   : > { %v640_v57 = vmul.f32 10.0, %v636_v47  ;;  %vm591_vm9 = vcmp.gt.f32.partialorder %v1513_v29, %v583_v51  ;;  %v585_v6 = vrot.slane %v1520_v40, 7  ;;  %vm716_vm10 = vcmp.eq.s32.totalorder %v1412_v23, 1 }
 0x139   : > { %v847_v25 = vcombine.high %v846_v49, %v846_v49  ;;  %v595_v39 = vsel %vm591_vm9, %v1513_v29, %v583_v51  ;;  %v599_v48 = vsel %vm591_vm9, 1.0, %v1229_v3  ;;  %v695_v52 = vsub.f32 %v416_v32, %v999_v46  ;;  %v1100_v54 = vpop.eup %1099 }
 0x13a   : > { %v607_v58 = vrot.slane %v595_v39, 7  ;;  %v623_v33 = vrot.slane %v599_v48, 7  ;;  %v732_v59 = vcombine.low %v1488_v45, %v680_v55  ;;  %v1001_v60 = vrot.slane %v687_v35, 11  ;;  %v1102_v61 = vpop.eup %1101 }
 0x13b   : > { %vm717_vm11 = vcmp.eq.s32.totalorder %v1414_v24, 1  ;;  %v532_v30 = vadd.f32 1.0, %v1100_v54  ;;  %1005 = vst.msk [vmem:[%s1382_s12 + $0x6] ss:$8 sm:$0xf] %vm1378_vm0, %v847_v25  ;;  %v720_v62 = vcombine.high %v695_v52, %v695_v52  ;;  %v724_v63 = vsel %vm714_vm4, %v695_v52, 0.0 }
 0x13c   : > { %vm593_vm13 = vcmp.gt.f32.partialorder %v1520_v40, %v585_v6  ;;  %v534_v45 = vadd.f32 1.0, %v1102_v61  ;;  %vm615_vm14 = vcmp.gt.f32.partialorder %v1513_v29, %v607_v58  ;;  %v739_v1 = vrot.slane %v732_v59, 7  ;;  %789 = vst [vmem:[%s1382_s12] sm:$0x3] %v724_v63 }
 0x13d   : > { %v597_v4 = vsel %vm593_vm13, %v1520_v40, %v585_v6  ;;  %1107 = vrcp.f32 %v532_v30  ;;  %v631_v7 = vsel %vm615_vm14, 2.0, %v623_v33  ;;  %v725_v8 = vsel %vm715_vm6, %v720_v62, 0.0 }
 0x13e   : > { %v601_v9 = vsel %vm593_vm13, 1.0, %v1229_v3  ;;  %1109 = vrcp.f32 %v534_v45  ;;  %v635_v10 = vadd.f32 1.0, %v631_v7  ;;  %v740_v5 = vsel %vm1552_vm12, %v1001_v60, %v739_v1  ;;  %790 = vst [vmem:[%s1382_s12 + $0x8] sm:$0x3] %v725_v8 }
 0x13f   : > { %v609_v11 = vrot.slane %v597_v4, 7  ;;  %v643_v12 = vrot.slane %v1513_v29, 1  ;;  %v747_v13 = vadd.f32 %v740_v5, %v416_v32  ;;  %v625_v14 = vrot.slane %v601_v9, 7 }
 0x140   : > { %v682_v16 = vmul.f32 %v1430_v34, %v1520_v40  ;;  %v652_v43 = vadd.f32 %v644_v53, %v640_v57  ;;  %v639_v3 = vmul.f32 10.0, %v635_v10  ;;  %v1000_v17 = vrot.slane %v1524_v31, 9  ;;  %v1104_v18 = vpop.eup %1103 }
 0x141   : > { %vm617_vm15 = vcmp.gt.f32.partialorder %v1520_v40, %v609_v11  ;;  %v751_v19 = vcombine.high %v747_v13, %v747_v13  ;;  %v755_v26 = vsel %vm714_vm4, %v747_v13, 0.0  ;;  %v1106_v29 = vpop.eup %1105  ;;  %v645_v44 = vrot.slane %v1520_v40, 1 }
 0x142   : > { %v633_v27 = vsel %vm617_vm15, 2.0, %v625_v14  ;;  %v733_v28 = vcombine.low %v1508_v20, %v682_v16  ;;  %v651_v35 = vadd.f32 %v643_v12, %v639_v3  ;;  %v797_v36 = vrot.slane %v755_v26, 6 }
 0x143   : > { %v637_v34 = vadd.f32 1.0, %v633_v27  ;;  %v696_v37 = vsub.f32 %v417_v42, %v1000_v17  ;;  %v756_v41 = vsel %vm715_vm6, %v751_v19, 0.0  ;;  %v1002_v38 = vrot.slane %v1524_v31, 11 }
 0x144   : > { %v743_v21 = vrot.slane %v733_v28, 7  ;;  %v763_v47 = vcombine.high %v1528_v50, %v651_v35  ;;  %v798_v53 = vrot.slane %v756_v41, 6  ;;  %805 = vst [vmem:[%s1382_s12] sm:$0xc] %v797_v36 }
 0x145   : > { %v641_v20 = vmul.f32 10.0, %v637_v34  ;;  %v721_v32 = vcombine.high %v696_v37, %v696_v37  ;;  %v726_v51 = vsel %vm716_vm10, %v696_v37, 0.0 }
 0x146   : > { %v744_v22 = vsel %vm1552_vm12, %v1002_v38, %v743_v21  ;;  %v771_v49 = vrot.slane %v763_v47, %v1457_v56  ;;  %806 = vst [vmem:[%s1382_s12 + $0x8] sm:$0xc] %v798_v53  ;;  %791 = vst [vmem:[%s1382_s12 + $0x10] sm:$0x3] %v726_v51 }
 0x147   : > { %v653_v40 = vadd.f32 %v645_v44, %v641_v20  ;;  %v727_v31 = vsel %vm717_vm11, %v721_v32, 0.0  ;;  %v748_v55 = vadd.f32 %v744_v22, %v417_v42  ;;  %v1108_v50 = vpop.eup %1107 }
 0x148   : > { %792 = vst [vmem:[%s1382_s12 + $0x18] sm:$0x3] %v727_v31  ;;  %v1110_v46 = vpop.eup %1109  ;;  %v547_v57 = vcombine.low %v1104_v18, %v1108_v50 }
 0x149   : > { %v752_v6 = vcombine.high %v748_v55, %v748_v55  ;;  %v757_v25 = vsel %vm716_vm10, %v748_v55, 0.0  ;;  %v764_v39 = vcombine.high %v652_v43, %v653_v40  ;;  %v548_v48 = vcombine.low %v1106_v29, %v1110_v46 }
 0x14a   : > { %v799_v52 = vrot.slane %v757_v25, 6  ;;  %v555_v54 = vrot.slane %v547_v57, %v1457_v56 }
 0x14b   : > { %v758_v58 = vsel %vm717_vm11, %v752_v6, 0.0  ;;  %v778_v33 = vrot.slane %v764_v39, %v1457_v56  ;;  %v562_v59 = vrot.slane %v548_v48, %v1457_v56 }
 0x14c   : > { %v800_v60 = vrot.slane %v758_v58, 6  ;;  %807 = vst [vmem:[%s1382_s12 + $0x10] sm:$0xc] %v799_v52 }
 0x14d   : > { %v779_v23 = vcombine.low %v771_v49, %v778_v33  ;;  %v563_v61 = vcombine.high %v555_v54, %v562_v59 }
 0x14e   : > { %808 = vst [vmem:[%s1382_s12 + $0x18] sm:$0xc] %v800_v60 }
 0x14f   : > { %v786_v30 = vrot.slane %v779_v23, %v1457_v56  ;;  %v570_v62 = vrot.slane %v563_v61, %v1457_v56 }
 0x151   : > { %v788_v24 = vsel %vm422_vm1, %v786_v30, 0.0  ;;  %v571_v63 = vcombine.high %v570_v62, %v570_v62 }
 0x152   : > { %1003 = vst.msk [vmem:[%s1382_s12 + $0x4] ss:$8 sm:$0xf] %vm1378_vm0, %v788_v24 }
 0x153   : > { %v573_v56 = vsel %vm422_vm1, %v571_v63, -1e+30 }
 0x154   : > { %1004 = vst.msk [vmem:[%s1382_s12 + $0x5] ss:$8 sm:$0xf] %vm1378_vm0, %v573_v56 }
 0x155   : > { %1154 = shalt.err (!%p1151_p5)
}
 0x156   : > { %s1155_s22 = scalar_lea.hbm %s1614_s5, 512  ;;  %s1159_s24 = scalar_lea.hbm %s1672_s4, 1024 }
 0x157   : > { %p1156_p4 = scmp.ne.s32.totalorder %s1614_s5, %s1155_s22  ;;  %p1160_p12 = scmp.lt.u32.totalorder %s1614_s5, %s1672_s4 }
 0x158   : > { %p1161_p1 = scmp.lt.u32.totalorder %s1159_s24, %s1155_s22  ;;  %p1163_p8 = scmp.lt.u32.totalorder %s1155_s22, %s1614_s5 }
 0x159   : > { %p1157_p7 = pnand %p1156_p4, %p1686_p9 }
 0x15a   : > { %p1162_p3 = por %p1161_p1, %p1160_p12 }
 0x15b   : > { %p1158_p10 = pneg %p1157_p7 }
 0x15c   : > { %p1164_p11 = por %p1163_p8, %p1162_p3 }
 0x15e   : > { %p1165_p0 = pnand %p1164_p11, %p1158_p10 }
 0x160   : > { %1168 = shalt.err (!%p1165_p0)
}
 0x161   : > { %1016 = dma.vmem_to_hbm [thread:$0]  (%p1686_p9), %s1616_s13, 512, %s1614_s5, %s856_s18  }
 0x162 PF: > { %s884_s10 = sand.u32 1, %s1203_s15   ;;  %p1687_p6 = scmp.ne.s32.totalorder %s1677_s30, 0 }
 0x163   : > { %p1688_p13 = scmp.ge.s32.totalorder %s1223_s20, 2  ;;  %s885_s27 = scalar_lea.sflag [#allocation4], %s884_s10 }
 0x165   : > { %p1023_p2 = pnand %p1688_p13, %p1687_p6 }
 0x167   : > { %1198 = dma.done.wait (!%p1023_p2), %s885_s27, 512  }
 0x168   : > { %1200 = vsyncadd (!%p1023_p2), %s885_s27, 4294966784  ;;  %s20_s20 = sadd.s32 1, %s1223_s20   ;;  %s1689_s15 = smov %s1207_s16 }
 0x169   : > { %p17_p5 = scmp.ge.s32.totalorder %s20_s20, 4   ;;  %s1690_s16 = smov %s1211_s17 }
 0x16a   : > { %s1691_s17 = smov %s1313_s29  ;;  %s1692_s18 = smov %s1219_s19 }
 0x16b   : > { %s1693_s19 = smov %s1695_s23  ;;  %19 = sbr.rel (!%p17_p5) target bundleno = 6 (0x6), region = 90 }
 0x172   :  { %890 = vsyncpa [#allocation3], 1 }
 0x173   :  { %892 = vsyncpa [#allocation3 + $0x1], 1 }
 0x174   :  { %893 = vsyncpa [#allocation4], 1 }
 0x175   :  { %895 = vsyncpa [#allocation4 + $0x1], 1 }

</bundles_post_ra>
